<compile_context>
chip_gen: v5e
topology: v5e:2x2
jax: 0.10.0
libtpu: 0.0.40
codegen_flags: <defaults>
</compile_context>

<pallas_src>
import functools

import numpy as np

import jax
import jax.numpy as jnp
from jax import lax
from jax.experimental import pallas as pl
from jax.experimental.pallas import tpu as pltpu

# Hyperparameters (BCBLearner defaults)
NUM_CKS = 12          # conv output channels / number of SubNets used
LEN_CKS = 3           # conv kernel length
NUM_CLASSES = 2
SUB_FEATS = 16        # SubNet output feature dim
BN_EPS = 1e-5


def _default_vmem_limit():
    # Generation-aware scoped-VMEM budget (v7x has only 64 MiB of physical VMEM).
    try:
        cap = int(pltpu.get_tpu_info().vmem_capacity_bytes)
    except Exception:
        cap = 64 * 1024 * 1024
    return int(min(max(cap // 2, 32 * 1024 * 1024), 96 * 1024 * 1024))


_VMEM_LIMIT_BYTES = _default_vmem_limit()


# --------------------------------------------------------------------------------------
# One-time parameter packing (hoisted out of the per-call path).
# --------------------------------------------------------------------------------------
def pack_params(params):
    conv_w, conv_b, bn_g, bn_b, sub_w, sub_b, cls_w, cls_b = params
    C, F, N = NUM_CKS, SUB_FEATS, NUM_CLASSES
    CF = C * F

    # Conv1d(1->C, k=3) taps + bias, row-per-channel: modes = cw @ [x_prev; x; x_next; 1].
    cw_pack = jnp.concatenate(
        [conv_w.astype(jnp.float32), conv_b.reshape(C, 1).astype(jnp.float32)], axis=1)  # (C, 4)

    # Raw BN affine params (gamma, beta); batch-stat folding happens later.
    bn_gb = jnp.stack([bn_g.astype(jnp.float32), bn_b.astype(jnp.float32)], axis=1)       # (C, 2)

    # Block-diagonal SubNet conv weights for a single fused K=3C matmul:
    # wblk[c*F+f, t*C + c'] = sub_w[c, f, t] * (c == c').
    eye_c = jnp.eye(C, dtype=jnp.float32)
    wblk = (sub_w.astype(jnp.float32)[:, :, :, None] * eye_c[:, None, None, :]).reshape(CF, 3 * C)
    pk = jnp.concatenate(
        [wblk, sub_b.reshape(CF, 1).astype(jnp.float32), cls_w.T.astype(jnp.float32)],
        axis=1)                                                                            # (CF, 3C+1+N)

    cb = cls_b.reshape(1, N).astype(jnp.float32)
    return dict(cw=cw_pack, bn=bn_gb, pk=pk, cb=cb)


def _make_seg(tb, L):
    # Segmented L-mean selector with the 1/L already folded in (host constant).
    seg = np.zeros((tb, tb * L), np.float32)
    for b in range(tb):
        seg[b, b * L:(b + 1) * L] = 1.0 / L
    return jnp.asarray(seg)


def _pick_batch_tile(B, L):
    # Single tile (fully fused kernel) for small problems; otherwise cap the tile so the
    # selector matmul / VMEM footprint stays bounded (TB<=256, TBL<=8192) per the v7x budget.
    if B * L <= 4096:
        return B
    best = None
    for tb in range(8, min(B, 256) + 1, 8):
        if B % tb != 0:
            continue
        tbl = tb * L
        if tbl % 128 != 0 or tbl > 8192:
            continue
        best = tb
    return best if best is not None else B


# --------------------------------------------------------------------------------------
# Shared in-kernel helpers (traced inline).
# --------------------------------------------------------------------------------------
def _shifted(v, pos, L):
    """Zero-padded left/right neighbours along the (b, l)-flattened lane axis."""
    tbl = v.shape[-1]
    v_prev = jnp.where(pos == 0, 0.0, pltpu.roll(v, 1, 1))           # v[b, l-1]
    v_next = jnp.where(pos == L - 1, 0.0, pltpu.roll(v, tbl - 1, 1))  # v[b, l+1]
    return v_prev, v_next


def _subnet_body(y, pos, L, pk_ref, cb_ref, seg_ref, feat_ref, out_ref):
    C, N = NUM_CKS, NUM_CLASSES
    y_prev, y_next = _shifted(y, pos, L)
    y_cat = jnp.concatenate([y_prev, y, y_next], axis=0)             # (3C, TBL)

    wblk = pk_ref[:, 0:3 * C]                                        # (CF, 3C)
    sb = pk_ref[:, 3 * C:3 * C + 1]                                  # (CF, 1)
    wcls = pk_ref[:, 3 * C + 1:3 * C + 1 + N]                        # (CF, N)

    # Single fused K=3C MXU matmul (was 3 K=C matmuls + 2 VPU adds), then ReLU.
    z = jnp.maximum(jnp.dot(wblk, y_cat, preferred_element_type=jnp.float32) + sb, 0.0)  # (CF, TBL)

    # Segmented mean over L: precomputed 1/L selector, contraction on the lane axis (MXU).
    feat = lax.dot_general(seg_ref[...], z, (((1,), (1,)), ((), ())),
                           preferred_element_type=jnp.float32)       # (TB, CF)
    feat_ref[...] = feat
    out_ref[...] = jnp.dot(feat, wcls, preferred_element_type=jnp.float32) + cb_ref[...]


# --------------------------------------------------------------------------------------
# Pass 1 (multi-tile path): conv + per-tile BN moment partial sums ("parallel" grid).
# --------------------------------------------------------------------------------------
def _conv_stats_kernel(x_ref, cw_ref, modes_ref, mom_ref, *, seq_len):
    L = seq_len
    C = NUM_CKS
    x = x_ref[...]                                                   # (1, TBL)
    tbl = x.shape[1]
    pos = lax.broadcasted_iota(jnp.int32, (1, tbl), 1) % L
    x_prev, x_next = _shifted(x, pos, L)

    x_taps = jnp.concatenate([x_prev, x, x_next, jnp.ones_like(x)], axis=0)   # (4, TBL)
    modes = jnp.dot(cw_ref[...], x_taps, preferred_element_type=jnp.float32)  # (C, TBL)
    modes_ref[...] = modes

    # Per-tile partial moments (sum, sum of squares) as one fused MXU matmul.
    stacked = jnp.concatenate([modes, modes * modes], axis=0)        # (2C, TBL)
    ones_col = jnp.ones((tbl, 1), jnp.float32)
    mom_ref[0] = jnp.dot(stacked, ones_col, preferred_element_type=jnp.float32)  # (2C, 1)


# --------------------------------------------------------------------------------------
# Pass 2 (multi-tile path): folded BN + fused SubNet conv/ReLU/L-mean + classifier.
# --------------------------------------------------------------------------------------
def _subnet_kernel(modes_ref, bn_ref, pk_ref, cb_ref, seg_ref, feat_ref, out_ref, *, seq_len):
    L = seq_len
    modes = modes_ref[...]                                           # (C, TBL)
    tbl = modes.shape[1]
    pos = lax.broadcasted_iota(jnp.int32, (1, tbl), 1) % L

    a = bn_ref[:, 0:1]                                               # folded BN scale
    b = bn_ref[:, 1:2]                                               # folded BN shift
    y = modes * a + b
    _subnet_body(y, pos, L, pk_ref, cb_ref, seg_ref, feat_ref, out_ref)


# --------------------------------------------------------------------------------------
# Fully fused single-tile kernel: conv + BN stats/finalize + SubNet + classifier.
# --------------------------------------------------------------------------------------
def _fused_kernel(x_ref, cw_ref, bn_ref, pk_ref, cb_ref, seg_ref,
                  modes_ref, feat_ref, out_ref, *, seq_len):
    L = seq_len
    C = NUM_CKS
    x = x_ref[...]                                                   # (1, B*L)
    bl = x.shape[1]
    pos = lax.broadcasted_iota(jnp.int32, (1, bl), 1) % L
    x_prev, x_next = _shifted(x, pos, L)

    x_taps = jnp.concatenate([x_prev, x, x_next, jnp.ones_like(x)], axis=0)   # (4, B*L)
    modes = jnp.dot(cw_ref[...], x_taps, preferred_element_type=jnp.float32)  # (C, B*L)
    modes_ref[...] = modes

    # BatchNorm training-mode batch stats on the resident tile (biased variance).
    # NOTE: single-pass E[x^2]-E[x]^2 in f32; fine for inference-scale B*L, use a
    # compensated scheme if this ever feeds training.
    stacked = jnp.concatenate([modes, modes * modes], axis=0)        # (2C, B*L)
    ones_col = jnp.ones((bl, 1), jnp.float32)
    mom = jnp.dot(stacked, ones_col, preferred_element_type=jnp.float32)      # (2C, 1)
    inv_n = 1.0 / float(bl)
    mean = mom[0:C, :] * inv_n
    var = jnp.maximum(mom[C:2 * C, :] * inv_n - mean * mean, 0.0)
    gamma = bn_ref[:, 0:1]
    beta = bn_ref[:, 1:2]
    a = gamma * lax.rsqrt(var + BN_EPS)
    b = beta - mean * a
    y = modes * a + b                                                # (C, B*L)

    _subnet_body(y, pos, L, pk_ref, cb_ref, seg_ref, feat_ref, out_ref)


# --------------------------------------------------------------------------------------
# Host wrapper
# --------------------------------------------------------------------------------------
def bcb_learner_forward(x, packed, *, batch_tile=None):
    """x: (B, 1, L) float32 (NCL).  packed: output of pack_params.
    Returns (modes, F, out) like the PyTorch module."""
    B, cin, L = x.shape
    assert cin == 1
    C, N = NUM_CKS, NUM_CLASSES
    CF = C * SUB_FEATS

    TB = _pick_batch_tile(B, L) if batch_tile is None else batch_tile
    assert B % TB == 0
    n_tiles = B // TB
    TBL = TB * L
    if n_tiles > 1:
        # (8, 128) block rule; also guarantees tiles never split a sequence (roll halos).
        assert TBL % 128 == 0 and TB % 8 == 0

    x_flat = x[:, 0, :].reshape(1, B * L).astype(jnp.float32)
    seg = _make_seg(TB, L)                                           # (TB, TBL) constant

    if n_tiles == 1:
        # Whole batch in one tile: one fused kernel, no HBM re-read of modes.
        fused_fn = functools.partial(_fused_kernel, seq_len=L)
        modes2d, feat, logits = pl.pallas_call(
            fused_fn,
            grid=(1,),
            out_shape=(
                jax.ShapeDtypeStruct((C, B * L), jnp.float32),
                jax.ShapeDtypeStruct((B, CF), jnp.float32),
                jax.ShapeDtypeStruct((B, N), jnp.float32),
            ),
            in_specs=[
                pl.BlockSpec((1, B * L), lambda i: (0, 0)),
                pl.BlockSpec((C, LEN_CKS + 1), lambda i: (0, 0)),
                pl.BlockSpec((C, 2), lambda i: (0, 0)),
                pl.BlockSpec((CF, 3 * C + 1 + N), lambda i: (0, 0)),
                pl.BlockSpec((1, N), lambda i: (0, 0)),
                pl.BlockSpec((TB, TBL), lambda i: (0, 0)),
            ],
            out_specs=(
                pl.BlockSpec((C, B * L), lambda i: (0, 0)),
                pl.BlockSpec((B, CF), lambda i: (0, 0)),
                pl.BlockSpec((B, N), lambda i: (0, 0)),
            ),
            compiler_params=pltpu.CompilerParams(
                dimension_semantics=("arbitrary",),
                vmem_limit_bytes=_VMEM_LIMIT_BYTES),
        )(x_flat, packed["cw"], packed["bn"], packed["pk"], packed["cb"], seg)
    else:
        # Pass 1: conv + per-tile partial moments (no resident accumulator -> "parallel").
        conv_fn = functools.partial(_conv_stats_kernel, seq_len=L)
        modes2d, mom = pl.pallas_call(
            conv_fn,
            grid=(n_tiles,),
            out_shape=(
                jax.ShapeDtypeStruct((C, B * L), jnp.float32),
                jax.ShapeDtypeStruct((n_tiles, 2 * C, 1), jnp.float32),
            ),
            in_specs=[
                pl.BlockSpec((1, TBL), lambda i: (0, i)),
                pl.BlockSpec((C, LEN_CKS + 1), lambda i: (0, 0)),
            ],
            out_specs=(
                pl.BlockSpec((C, TBL), lambda i: (0, i)),
                pl.BlockSpec((1, 2 * C, 1), lambda i: (i, 0, 0)),
            ),
            compiler_params=pltpu.CompilerParams(
                dimension_semantics=("parallel",),
                vmem_limit_bytes=_VMEM_LIMIT_BYTES),
        )(x_flat, packed["cw"])

        # BN finalize (tiny per-channel scalars) in host JAX, folded to y = a*x + b.
        n = float(B * L)
        mom_sum = jnp.sum(mom[:, :, 0], axis=0)                      # (2C,)
        mean = (mom_sum[:C] / n).reshape(C, 1)
        var = jnp.maximum((mom_sum[C:] / n).reshape(C, 1) - mean * mean, 0.0)
        gamma = packed["bn"][:, 0:1]
        beta = packed["bn"][:, 1:2]
        a = gamma * lax.rsqrt(var + BN_EPS)
        b = beta - mean * a
        bn_ab = jnp.concatenate([a, b], axis=1)                      # (C, 2)

        # Pass 2: BN apply + fused SubNet conv/ReLU/mean + classifier ("parallel" tiles).
        sub_fn = functools.partial(_subnet_kernel, seq_len=L)
        feat, logits = pl.pallas_call(
            sub_fn,
            grid=(n_tiles,),
            out_shape=(
                jax.ShapeDtypeStruct((B, CF), jnp.float32),
                jax.ShapeDtypeStruct((B, N), jnp.float32),
            ),
            in_specs=[
                pl.BlockSpec((C, TBL), lambda i: (0, i)),
                pl.BlockSpec((C, 2), lambda i: (0, 0)),
                pl.BlockSpec((CF, 3 * C + 1 + N), lambda i: (0, 0)),
                pl.BlockSpec((1, N), lambda i: (0, 0)),
                pl.BlockSpec((TB, TBL), lambda i: (0, 0)),
            ],
            out_specs=(
                pl.BlockSpec((TB, CF), lambda i: (i, 0)),
                pl.BlockSpec((TB, N), lambda i: (i, 0)),
            ),
            compiler_params=pltpu.CompilerParams(
                dimension_semantics=("parallel",),
                vmem_limit_bytes=_VMEM_LIMIT_BYTES),
        )(modes2d, bn_ab, packed["pk"], packed["cb"], seg)

    modes = modes2d.reshape(C, B, L).transpose(1, 0, 2)              # (B, C, L) module layout
    return modes, feat, logits


# --------------------------------------------------------------------------------------
# Pure-JAX reference (same assumed SubNet), params init, and self-check.
# --------------------------------------------------------------------------------------
def _reference_forward(x, params):
    conv_w, conv_b, bn_g, bn_b, sub_w, sub_b, cls_w, cls_b = params
    B, _, L = x.shape
    xs = x[:, 0, :]
    xp = jnp.pad(xs, ((0, 0), (1, 0)))[:, :L]
    xn = jnp.pad(xs, ((0, 0), (0, 1)))[:, 1:]
    modes = (conv_w[None, :, 0, None] * xp[:, None, :]
             + conv_w[None, :, 1, None] * xs[:, None, :]
             + conv_w[None, :, 2, None] * xn[:, None, :]
             + conv_b[None, :, None])                                # (B, C, L)
    mean = modes.mean(axis=(0, 2), keepdims=True)
    var = ((modes - mean) ** 2).mean(axis=(0, 2), keepdims=True)
    y = (modes - mean) * lax.rsqrt(var + BN_EPS) * bn_g[None, :, None] + bn_b[None, :, None]
    yp = jnp.pad(y, ((0, 0), (0, 0), (1, 0)))[:, :, :L]
    yn = jnp.pad(y, ((0, 0), (0, 0), (0, 1)))[:, :, 1:]
    z = (sub_w[None, :, :, 0, None] * yp[:, :, None, :]
         + sub_w[None, :, :, 1, None] * y[:, :, None, :]
         + sub_w[None, :, :, 2, None] * yn[:, :, None, :]
         + sub_b[None, :, :, None])                                  # (B, C, F, L)
    v = jnp.maximum(z, 0.0).mean(axis=3)                             # (B, C, F)
    feat = v.reshape(B, -1)
    logits = feat @ cls_w.T + cls_b[None, :]
    return modes, feat, logits


def init_params(key):
    ks = jax.random.split(key, 6)
    b_conv = 1.0 / jnp.sqrt(1.0 * LEN_CKS)
    conv_w = jax.random.uniform(ks[0], (NUM_CKS, LEN_CKS), jnp.float32, -b_conv, b_conv)
    conv_b = jax.random.uniform(ks[1], (NUM_CKS,), jnp.float32, -b_conv, b_conv)
    bn_g = jnp.ones((NUM_CKS,), jnp.float32)
    bn_b = jnp.zeros((NUM_CKS,), jnp.float32)
    sub_w = jax.random.uniform(ks[2], (NUM_CKS, SUB_FEATS, LEN_CKS), jnp.float32, -b_conv, b_conv)
    sub_b = jax.random.uniform(ks[3], (NUM_CKS, SUB_FEATS), jnp.float32, -b_conv, b_conv)
    b_cls = 1.0 / jnp.sqrt(float(SUB_FEATS * NUM_CKS))
    cls_w = jax.random.uniform(ks[4], (NUM_CLASSES, SUB_FEATS * NUM_CKS), jnp.float32, -b_cls, b_cls)
    cls_b = jax.random.uniform(ks[5], (NUM_CLASSES,), jnp.float32, -b_cls, b_cls)
    return (conv_w, conv_b, bn_g, bn_b, sub_w, sub_b, cls_w, cls_b)


if __name__ == "__main__":
    key = jax.random.PRNGKey(0)
    pkey, xkey, xkey2 = jax.random.split(key, 3)
    params = init_params(pkey)
    packed = pack_params(params)           # one-time parameter packing (hoisted)

    fwd = jax.jit(bcb_learner_forward, static_argnames=("batch_tile",))

    # Case 1: tiny batch -> single fully-fused kernel.
    B, L = 2, 16
    x = jax.random.normal(xkey, (B, 1, L), jnp.float32)              # (batch, in_channels=1, length)
    modes, feat, logits = fwd(x, packed)
    jax.block_until_ready((modes, feat, logits))
    assert modes.shape == (B, NUM_CKS, L)
    assert feat.shape == (B, SUB_FEATS * NUM_CKS)
    assert logits.shape == (B, NUM_CLASSES)
    r_modes, r_feat, r_logits = _reference_forward(x, params)
    ok1 = (jnp.allclose(modes, r_modes, atol=2e-2, rtol=2e-2)
           and jnp.allclose(feat, r_feat, atol=2e-2, rtol=2e-2)
           and jnp.allclose(logits, r_logits, atol=2e-2, rtol=2e-2))

    # Case 2: exercise the tiled two-pass path (2 tiles of 8 rows, TBL = 128).
    B2 = 16
    x2 = jax.random.normal(xkey2, (B2, 1, L), jnp.float32)
    modes2, feat2, logits2 = fwd(x2, packed, batch_tile=8)
    jax.block_until_ready((modes2, feat2, logits2))
    r2_modes, r2_feat, r2_logits = _reference_forward(x2, params)
    ok2 = (jnp.allclose(modes2, r2_modes, atol=2e-2, rtol=2e-2)
           and jnp.allclose(feat2, r2_feat, atol=2e-2, rtol=2e-2)
           and jnp.allclose(logits2, r2_logits, atol=2e-2, rtol=2e-2))

    assert bool(ok1) and bool(ok2), "Pallas output does not match pure-JAX reference"
    print("KERNEL_OK")
</pallas_src>

<mosaic_0001>
module attributes {stable_mosaic.version = 11 : i64} {
  func.func @_fused_kernel(%arg0: i32, %arg1: memref<1x32xf32, #tpu.memory_space<vmem>>, %arg2: memref<12x4xf32, #tpu.memory_space<vmem>>, %arg3: memref<12x2xf32, #tpu.memory_space<vmem>>, %arg4: memref<192x39xf32, #tpu.memory_space<vmem>>, %arg5: memref<1x2xf32, #tpu.memory_space<vmem>>, %arg6: memref<2x32xf32, #tpu.memory_space<vmem>>, %arg7: memref<12x32xf32, #tpu.memory_space<vmem>>, %arg8: memref<2x192xf32, #tpu.memory_space<vmem>>, %arg9: memref<2x2xf32, #tpu.memory_space<vmem>>) attributes {dimension_semantics = [#tpu.dimension_semantics<arbitrary>], iteration_bounds = array<i64: 1>, scalar_prefetch = 0 : i64, scratch_operands = 0 : i64, tpu.core_type = #tpu.core_type<tc>, window_params = [{pipeline_mode = #tpu.pipeline_mode<synchronous>, transform_indices = @transform_0, window_bounds = array<i64: 1, 32>}, {pipeline_mode = #tpu.pipeline_mode<synchronous>, transform_indices = @transform_1, window_bounds = array<i64: 12, 4>}, {pipeline_mode = #tpu.pipeline_mode<synchronous>, transform_indices = @transform_2, window_bounds = array<i64: 12, 2>}, {pipeline_mode = #tpu.pipeline_mode<synchronous>, transform_indices = @transform_3, window_bounds = array<i64: 192, 39>}, {pipeline_mode = #tpu.pipeline_mode<synchronous>, transform_indices = @transform_4, window_bounds = array<i64: 1, 2>}, {pipeline_mode = #tpu.pipeline_mode<synchronous>, transform_indices = @transform_5, window_bounds = array<i64: 2, 32>}, {pipeline_mode = #tpu.pipeline_mode<synchronous>, transform_indices = @transform_6, window_bounds = array<i64: 12, 32>}, {pipeline_mode = #tpu.pipeline_mode<synchronous>, transform_indices = @transform_7, window_bounds = array<i64: 2, 192>}, {pipeline_mode = #tpu.pipeline_mode<synchronous>, transform_indices = @transform_8, window_bounds = array<i64: 2, 2>}]} {
    %c0 = arith.constant 0 : index
    %c0_0 = arith.constant 0 : index
    %0 = vector.load %arg1[%c0, %c0_0] : memref<1x32xf32, #tpu.memory_space<vmem>>, vector<1x32xf32>
    %1 = tpu.iota {dimensions = array<i32: 1>} : vector<1x32xi32>
    %c16_i32 = arith.constant 16 : i32
    %c0_i32 = arith.constant 0 : i32
    %2 = arith.cmpi eq, %c16_i32, %c0_i32 : i32
    %c1_i32 = arith.constant 1 : i32
    %3 = arith.select %2, %c1_i32, %c16_i32 : i32
    %4 = vector.broadcast %3 : i32 to vector<1x32xi32>
    %5 = arith.remsi %1, %4 : vector<1x32xi32>
    %c0_i32_1 = arith.constant 0 : i32
    %6 = vector.broadcast %c0_i32_1 : i32 to vector<1x32xi32>
    %7 = arith.cmpi ne, %5, %6 : vector<1x32xi32>
    %c0_i32_2 = arith.constant 0 : i32
    %8 = vector.broadcast %c0_i32_2 : i32 to vector<1x32xi32>
    %9 = arith.cmpi slt, %5, %8 : vector<1x32xi32>
    %c0_i32_3 = arith.constant 0 : i32
    %10 = arith.cmpi slt, %3, %c0_i32_3 : i32
    %11 = vector.broadcast %10 : i1 to vector<1x32xi1>
    %12 = vector.broadcast %11 : vector<1x32xi1> to vector<1x32xi1>
    %13 = arith.xori %9, %12 : vector<1x32xi1>
    %14 = arith.andi %13, %7 : vector<1x32xi1>
    %15 = vector.broadcast %3 : i32 to vector<1x32xi32>
    %16 = arith.addi %5, %15 : vector<1x32xi32>
    %17 = arith.select %14, %16, %5 : vector<1x32xi1>, vector<1x32xi32>
    %c0_i32_4 = arith.constant 0 : i32
    %18 = vector.broadcast %c0_i32_4 : i32 to vector<1x32xi32>
    %19 = arith.cmpi eq, %17, %18 : vector<1x32xi32>
    %c1_i32_5 = arith.constant 1 : i32
    %20 = tpu.dynamic_rotate %0 by %c1_i32_5 dim 1 : vector<1x32xf32>, i32 -> vector<1x32xf32>
    %cst = arith.constant 0.000000e+00 : f32
    %21 = vector.broadcast %cst : f32 to vector<1x32xf32>
    %22 = arith.select %19, %21, %20 : vector<1x32xi1>, vector<1x32xf32>
    %c15_i32 = arith.constant 15 : i32
    %23 = vector.broadcast %c15_i32 : i32 to vector<1x32xi32>
    %24 = arith.cmpi eq, %17, %23 : vector<1x32xi32>
    %c31_i32 = arith.constant 31 : i32
    %25 = tpu.dynamic_rotate %0 by %c31_i32 dim 1 : vector<1x32xf32>, i32 -> vector<1x32xf32>
    %cst_6 = arith.constant 0.000000e+00 : f32
    %26 = vector.broadcast %cst_6 : f32 to vector<1x32xf32>
    %27 = arith.select %24, %26, %25 : vector<1x32xi1>, vector<1x32xf32>
    %cst_7 = arith.constant 1.000000e+00 : f32
    %28 = vector.broadcast %cst_7 : f32 to vector<1x32xf32>
    %29 = tpu.concatenate %22, %0, %27, %28 in 0 : vector<1x32xf32>, vector<1x32xf32>, vector<1x32xf32>, vector<1x32xf32> -> vector<4x32xf32>
    %c0_8 = arith.constant 0 : index
    %c0_9 = arith.constant 0 : index
    %30 = vector.load %arg2[%c0_8, %c0_9] : memref<12x4xf32, #tpu.memory_space<vmem>>, vector<12x4xf32>
    %cst_10 = arith.constant dense<0.000000e+00> : vector<12x32xf32>
    %31 = tpu.matmul %30, %29, %cst_10 {dimension_numbers = #tpu.dot_dimension_numbers<[1], [0], [0], [1], [0, 0, 1, 1], [], []>} : vector<12x4xf32>, vector<4x32xf32>, vector<12x32xf32> -> vector<12x32xf32>
    %c0_11 = arith.constant 0 : index
    %c0_12 = arith.constant 0 : index
    %32 = vector.load %arg7[%c0_11, %c0_12] : memref<12x32xf32, #tpu.memory_space<vmem>>, vector<12x32xf32>
    tpu.vector_store %arg7[%c0_11, %c0_12], %31 {strides = array<i32>} : memref<12x32xf32, #tpu.memory_space<vmem>>, vector<12x32xf32>,
    %33 = arith.mulf %31, %31 : vector<12x32xf32>
    %34 = tpu.concatenate %31, %33 in 0 : vector<12x32xf32>, vector<12x32xf32> -> vector<24x32xf32>
    %cst_13 = arith.constant 1.000000e+00 : f32
    %35 = vector.broadcast %cst_13 : f32 to vector<32x1xf32>
    %cst_14 = arith.constant dense<0.000000e+00> : vector<24x1xf32>
    %36 = tpu.matmul %34, %35, %cst_14 {dimension_numbers = #tpu.dot_dimension_numbers<[1], [0], [0], [1], [0, 0, 1, 1], [], []>} : vector<24x32xf32>, vector<32x1xf32>, vector<24x1xf32> -> vector<24x1xf32>
    %37 = vector.extract_strided_slice %36 {offsets = [0, 0], sizes = [12, 1], strides = [1, 1]} : vector<24x1xf32> to vector<12x1xf32>
    %cst_15 = arith.constant 3.125000e-02 : f32
    %38 = vector.broadcast %cst_15 : f32 to vector<12x1xf32>
    %39 = arith.mulf %37, %38 : vector<12x1xf32>
    %40 = vector.extract_strided_slice %36 {offsets = [12, 0], sizes = [12, 1], strides = [1, 1]} : vector<24x1xf32> to vector<12x1xf32>
    %cst_16 = arith.constant 3.125000e-02 : f32
    %41 = vector.broadcast %cst_16 : f32 to vector<12x1xf32>
    %42 = arith.mulf %40, %41 : vector<12x1xf32>
    %43 = arith.mulf %39, %39 : vector<12x1xf32>
    %44 = arith.subf %42, %43 : vector<12x1xf32>
    %cst_17 = arith.constant 0.000000e+00 : f32
    %45 = vector.broadcast %cst_17 : f32 to vector<12x1xf32>
    %46 = arith.maximumf %44, %45 : vector<12x1xf32>
    %c0_18 = arith.constant 0 : index
    %c0_19 = arith.constant 0 : index
    %47 = vector.load %arg3[%c0_18, %c0_19] : memref<12x2xf32, #tpu.memory_space<vmem>>, vector<12x1xf32>
    %c0_20 = arith.constant 0 : index
    %c1 = arith.constant 1 : index
    %48 = vector.load %arg3[%c0_20, %c1] : memref<12x2xf32, #tpu.memory_space<vmem>>, vector<12x1xf32>
    %cst_21 = arith.constant 9.99999974E-6 : f32
    %49 = vector.broadcast %cst_21 : f32 to vector<12x1xf32>
    %50 = arith.addf %46, %49 : vector<12x1xf32>
    %51 = math.rsqrt %50 : vector<12x1xf32>
    %52 = arith.mulf %47, %51 : vector<12x1xf32>
    %53 = arith.mulf %39, %52 : vector<12x1xf32>
    %54 = arith.subf %48, %53 : vector<12x1xf32>
    %55 = vector.broadcast %52 : vector<12x1xf32> to vector<12x32xf32>
    %56 = arith.mulf %31, %55 : vector<12x32xf32>
    %57 = vector.broadcast %54 : vector<12x1xf32> to vector<12x32xf32>
    %58 = arith.addf %56, %57 : vector<12x32xf32>
    %c0_i32_22 = arith.constant 0 : i32
    %59 = vector.broadcast %c0_i32_22 : i32 to vector<1x32xi32>
    %60 = arith.cmpi eq, %17, %59 : vector<1x32xi32>
    %c1_i32_23 = arith.constant 1 : i32
    %61 = tpu.dynamic_rotate %58 by %c1_i32_23 dim 1 : vector<12x32xf32>, i32 -> vector<12x32xf32>
    %cst_24 = arith.constant 0.000000e+00 : f32
    %62 = vector.shape_cast %60 : vector<1x32xi1> to vector<1x32xi1>
    %63 = vector.broadcast %62 : vector<1x32xi1> to vector<12x32xi1>
    %64 = vector.broadcast %cst_24 : f32 to vector<12x32xf32>
    %65 = arith.select %63, %64, %61 : vector<12x32xi1>, vector<12x32xf32>
    %c15_i32_25 = arith.constant 15 : i32
    %66 = vector.broadcast %c15_i32_25 : i32 to vector<1x32xi32>
    %67 = arith.cmpi eq, %17, %66 : vector<1x32xi32>
    %c31_i32_26 = arith.constant 31 : i32
    %68 = tpu.dynamic_rotate %58 by %c31_i32_26 dim 1 : vector<12x32xf32>, i32 -> vector<12x32xf32>
    %cst_27 = arith.constant 0.000000e+00 : f32
    %69 = vector.shape_cast %67 : vector<1x32xi1> to vector<1x32xi1>
    %70 = vector.broadcast %69 : vector<1x32xi1> to vector<12x32xi1>
    %71 = vector.broadcast %cst_27 : f32 to vector<12x32xf32>
    %72 = arith.select %70, %71, %68 : vector<12x32xi1>, vector<12x32xf32>
    %73 = tpu.concatenate %65, %58, %72 in 0 : vector<12x32xf32>, vector<12x32xf32>, vector<12x32xf32> -> vector<36x32xf32>
    %c0_28 = arith.constant 0 : index
    %c0_29 = arith.constant 0 : index
    %74 = vector.load %arg4[%c0_28, %c0_29] : memref<192x39xf32, #tpu.memory_space<vmem>>, vector<192x36xf32>
    %c0_30 = arith.constant 0 : index
    %c36 = arith.constant 36 : index
    %75 = vector.load %arg4[%c0_30, %c36] : memref<192x39xf32, #tpu.memory_space<vmem>>, vector<192x1xf32>
    %c0_31 = arith.constant 0 : index
    %c37 = arith.constant 37 : index
    %76 = vector.load %arg4[%c0_31, %c37] : memref<192x39xf32, #tpu.memory_space<vmem>>, vector<192x2xf32>
    %cst_32 = arith.constant dense<0.000000e+00> : vector<192x32xf32>
    %77 = tpu.matmul %74, %73, %cst_32 {dimension_numbers = #tpu.dot_dimension_numbers<[1], [0], [0], [1], [0, 0, 1, 1], [], []>} : vector<192x36xf32>, vector<36x32xf32>, vector<192x32xf32> -> vector<192x32xf32>
    %78 = vector.broadcast %75 : vector<192x1xf32> to vector<192x32xf32>
    %79 = arith.addf %77, %78 : vector<192x32xf32>
    %cst_33 = arith.constant 0.000000e+00 : f32
    %80 = vector.broadcast %cst_33 : f32 to vector<192x32xf32>
    %81 = arith.maximumf %79, %80 : vector<192x32xf32>
    %c0_34 = arith.constant 0 : index
    %c0_35 = arith.constant 0 : index
    %82 = vector.load %arg6[%c0_34, %c0_35] : memref<2x32xf32, #tpu.memory_space<vmem>>, vector<2x32xf32>
    %cst_36 = arith.constant dense<0.000000e+00> : vector<2x192xf32>
    %83 = tpu.matmul %82, %81, %cst_36 {dimension_numbers = #tpu.dot_dimension_numbers<[1], [1], [0], [0], [0, 0, 1, 0], [], []>} : vector<2x32xf32>, vector<192x32xf32>, vector<2x192xf32> -> vector<2x192xf32>
    %c0_37 = arith.constant 0 : index
    %c0_38 = arith.constant 0 : index
    %84 = vector.load %arg8[%c0_37, %c0_38] : memref<2x192xf32, #tpu.memory_space<vmem>>, vector<2x192xf32>
    tpu.vector_store %arg8[%c0_37, %c0_38], %83 {strides = array<i32>} : memref<2x192xf32, #tpu.memory_space<vmem>>, vector<2x192xf32>,
    %cst_39 = arith.constant dense<0.000000e+00> : vector<2x2xf32>
    %85 = tpu.matmul %83, %76, %cst_39 {dimension_numbers = #tpu.dot_dimension_numbers<[1], [0], [0], [1], [0, 0, 1, 1], [], []>} : vector<2x192xf32>, vector<192x2xf32>, vector<2x2xf32> -> vector<2x2xf32>
    %c0_40 = arith.constant 0 : index
    %c0_41 = arith.constant 0 : index
    %86 = vector.load %arg5[%c0_40, %c0_41] : memref<1x2xf32, #tpu.memory_space<vmem>>, vector<1x2xf32>
    %87 = vector.broadcast %86 : vector<1x2xf32> to vector<2x2xf32>
    %88 = arith.addf %85, %87 : vector<2x2xf32>
    %c0_42 = arith.constant 0 : index
    %c0_43 = arith.constant 0 : index
    %89 = vector.load %arg9[%c0_42, %c0_43] : memref<2x2xf32, #tpu.memory_space<vmem>>, vector<2x2xf32>
    tpu.vector_store %arg9[%c0_42, %c0_43], %88 {strides = array<i32>} : memref<2x2xf32, #tpu.memory_space<vmem>>, vector<2x2xf32>,
    return
  }
  func.func @transform_0(%arg0: i32) -> (i32, i32) {
    %c0_i32 = arith.constant 0 : i32
    %c0_i32_0 = arith.constant 0 : i32
    %c0_i32_1 = arith.constant 0 : i32
    return %c0_i32, %c0_i32_0 : i32, i32
  }
  func.func @transform_1(%arg0: i32) -> (i32, i32) {
    %c0_i32 = arith.constant 0 : i32
    %c0_i32_0 = arith.constant 0 : i32
    %c0_i32_1 = arith.constant 0 : i32
    return %c0_i32, %c0_i32_0 : i32, i32
  }
  func.func @transform_2(%arg0: i32) -> (i32, i32) {
    %c0_i32 = arith.constant 0 : i32
    %c0_i32_0 = arith.constant 0 : i32
    %c0_i32_1 = arith.constant 0 : i32
    return %c0_i32, %c0_i32_0 : i32, i32
  }
  func.func @transform_3(%arg0: i32) -> (i32, i32) {
    %c0_i32 = arith.constant 0 : i32
    %c0_i32_0 = arith.constant 0 : i32
    %c0_i32_1 = arith.constant 0 : i32
    return %c0_i32, %c0_i32_0 : i32, i32
  }
  func.func @transform_4(%arg0: i32) -> (i32, i32) {
    %c0_i32 = arith.constant 0 : i32
    %c0_i32_0 = arith.constant 0 : i32
    %c0_i32_1 = arith.constant 0 : i32
    return %c0_i32, %c0_i32_0 : i32, i32
  }
  func.func @transform_5(%arg0: i32) -> (i32, i32) {
    %c0_i32 = arith.constant 0 : i32
    %c0_i32_0 = arith.constant 0 : i32
    %c0_i32_1 = arith.constant 0 : i32
    return %c0_i32, %c0_i32_0 : i32, i32
  }
  func.func @transform_6(%arg0: i32) -> (i32, i32) {
    %c0_i32 = arith.constant 0 : i32
    %c0_i32_0 = arith.constant 0 : i32
    %c0_i32_1 = arith.constant 0 : i32
    return %c0_i32, %c0_i32_0 : i32, i32
  }
  func.func @transform_7(%arg0: i32) -> (i32, i32) {
    %c0_i32 = arith.constant 0 : i32
    %c0_i32_0 = arith.constant 0 : i32
    %c0_i32_1 = arith.constant 0 : i32
    return %c0_i32, %c0_i32_0 : i32, i32
  }
  func.func @transform_8(%arg0: i32) -> (i32, i32) {
    %c0_i32 = arith.constant 0 : i32
    %c0_i32_0 = arith.constant 0 : i32
    %c0_i32_1 = arith.constant 0 : i32
    return %c0_i32, %c0_i32_0 : i32, i32
  }
}

</mosaic_0001>

<bundles_post_ra>
// kernel: squeeze.1
= control target key start
LH: loop header
LB: loop body
LE: loop exit
PB: predicated region body
PF: predicated region fallthrough
CT: control target
= control target key end

     0   :  { %vm7_vm0 = vcmask 130048   ;;  %vm13_vm1 = vcmask 261248   ;;  %s39_s0 = inlined_call_operand.vmem [shape: f32[2,16], index: 0, kind: input, shape index: {}]   ;;  %s40_s1 = inlined_call_operand.vmem [shape: f32[1,32], index: 1, kind: output, shape index: {}]  }
   0x1   :  { %v4_v0 = vld [vmem:[%s39_s0] sm:$0x3]  ;;  %s22_s0 = smov 16  }
   0x2   :  { %5 = vst [vmem:[#allocation1] sm:$0x3] %v4_v0 }
   0x9   :  { %v10_v1 = vld [vmem:[#allocation1 + $0x1] sm:$0x1]   ;;  %v6_v2 = vld [vmem:[#allocation1] sm:$0x1]  }
   0xa   :  { %11 = vrot.lane.b32.xlu0 %v10_v1, %s22_s0  ;;  %8 = vst.msk [vmem:[#allocation0] sm:$0x1] %vm7_vm0, %v6_v2  }
  0x7c   :  { %v12_v3 = vpop.permute.xlu0 %11  }
  0x7d   :  { %14 = vst.msk [vmem:[#allocation0] sm:$0x1] %vm13_vm1, %v12_v3  }
  0x84   :  { %v17_v4 = vld [vmem:[#allocation0] sm:$0x1] }
  0x85   :  { %20 = vst [vmem:[%s40_s1] sm:$0x1] %v17_v4 }

// kernel: bcb_learner_forward.1
= control target key start
LH: loop header
LB: loop body
LE: loop exit
PB: predicated region body
PF: predicated region fallthrough
CT: control target
= control target key end

     0   :  { %14 = vsyncpa [#allocation3], 0  ;;  %s1080_s29 = smov 32   ;;  %s1522_s0 = inlined_call_operand.vmem [shape: f32[1,32], index: 0, kind: input, shape index: {}]   ;;  %s1523_s1 = inlined_call_operand.vmem [shape: f32[12,4], index: 1, kind: input, shape index: {}]   ;;  %s1524_s2 = inlined_call_operand.vmem [shape: f32[12,2], index: 2, kind: input, shape index: {}]   ;;  %s1525_s3 = inlined_call_operand.vmem [shape: f32[192,39], index: 3, kind: input, shape index: {}]   ;;  %s1526_s4 = inlined_call_operand.vmem [shape: f32[1,2], index: 4, kind: input, shape index: {}]   ;;  %s1527_s5 = inlined_call_operand.vmem [shape: f32[2,32], index: 5, kind: input, shape index: {}]   ;;  %s1528_s6 = inlined_call_operand.vmem [shape: f32[12,32], index: 6, kind: output, shape index: {0}]   ;;  %s1529_s7 = inlined_call_operand.hbm [shape: f32[2,192], index: 7, kind: output, shape index: {1}]   ;;  %s1530_s8 = inlined_call_operand.hbm [shape: f32[2,2], index: 8, kind: output, shape index: {2}]  }
   0x1   :  { %v28_v0 = vld [vmem:[%s1522_s0] sm:$0x1] }
   0x2   :  { %45 = vrot.lane.b32.xlu0 %v28_v0, %s1080_s29 }
   0x3   :  { %15 = vsyncpa [#allocation5], 0  ;;  %vm44_vm0 = vcmask 1047808   ;;  %s1081_s30 = smov 127   ;;  %s1082_s9 = smov 97   ;;  %v29_v5 = vlaneseq  ;;  %v1083_v6 = vmov 1.0  }
   0x4   :  { %142 = vmatpush.msra.mxu1 %v1083_v6  ;;  %v1022_v13 = vld [vmem:[%s1522_s0] ss:$0 sm:$0xff]  ;;  %vm67_vm3 = vcmask 1040384   ;;  %vm69_vm4 = vcmask 1041408   ;;  %vm71_vm5 = vcmask 1042432   ;;  %vm82_vm6 = vcmask 1043456  }
   0x5   :  { %v30_v7 = vand.u32 127, %v29_v5  ;;  %v73_v19 = vld [vmem:[%s1523_s1] sm:$0xff]  ;;  %vm75_vm7 = vcmask 31744   ;;  %v74_v21 = vld [vmem:[%s1523_s1 + $0x8] sm:$0xf]  ;;  %vm109_vm8 = vcmask 261120  }
   0x6   :  { %143 = vmatpush.msra.mxu1 %v1083_v6  ;;  %vm111_vm9 = vcmask 257024   ;;  %v1084_v33 = vmov 0   ;;  %v173_v60 = vld [vmem:[%s1524_s2 + $0x8] sm:$0xf]  ;;  %s1085_s21 = smov 1   ;;  %v1292_v10 = vld [vmem:[%s1525_s3 + $0xa0] sm:$0xff] }
   0x7   :  { %v35_v8 = vand.u32 15, %v30_v7  ;;  %956 = vset.pattern.permute.xlu0 %v1084_v33  ;;  %957 = vset.pattern.permute.xlu2 %v1084_v33  ;;  %v1086_v7 = vmov 1   ;;  %v1229_v33 = vld [vmem:[%s1525_s3 + $0x50] sm:$0xff]  ;;  %v1312_v12 = vld [vmem:[%s1525_s3 + $0x58] sm:$0xff]  ;;  %s846_s22 = sshll.u32 %s1529_s7, 4  ;;  %s1090_s25 = smov [#allocation4]   ;;  %s847_s22 = int_to_ptr.hbm [resolvable:$true] %s846_s22 }
   0x8   :  { %144 = vmatpush.msra.mxu1 %v1083_v6  ;;  %958 = vset.pattern.permute.xlu1 %v1086_v7  ;;  %s855_s26 = sshll.u32 %s1090_s25, 4  ;;  %s857_s28 = sshll.u32 %s1530_s8, 4  ;;  %s856_s26 = int_to_ptr.vmem [resolvable:$true] %s855_s26  ;;  %s858_s28 = int_to_ptr.hbm [resolvable:$true] %s857_s28 }
   0x9   :  { %vm1145_vm1 = vcmp.eq.s32.totalorder %v35_v8, 15  ;;  %vm1151_vm2 = vcmp.eq.s32.totalorder %v35_v8, 0 }
   0xa   :  { %145 = vmatpush.msra.mxu1 %v1083_v6 }
  0x74   :  { %v46_v1 = vpop.permute.xlu0 %45 }
  0x75   :  { %v47_v2 = vsel %vm44_vm0, %v46_v1, %v28_v0 }
  0x76   :  { %48 = vrot.lane.b32.xlu0 %v47_v2, %s1080_s29 }
  0xe8   :  { %v49_v3 = vpop.permute.xlu0 %48 }
  0xe9   :  { %v50_v4 = vsel %vm44_vm0, %v49_v3, %v28_v0  ;;  %v172_v3 = vld [vmem:[%s1524_s2] sm:$0xff] }
  0xea   :  { %57 = vrot.lane.b32.xlu1 %v50_v4, %s1081_s30 }
  0xf2   :  { %52 = vrot.lane.b32.xlu1 %v50_v4, %s1082_s9 }
 0x15c   :  { %v58_v9 = vpop.permute.xlu1 %57 }
 0x15d   :  { %v60_v11 = vsel %vm1145_vm1, 0.0, %v58_v9 }
 0x15e   :  { %v65_v15 = vrot.slane %v60_v11, 6 }
 0x164   :  { %v53_v14 = vpop.permute.xlu1 %52 }
 0x165   :  { %v55_v16 = vsel %vm1151_vm2, 0.0, %v53_v14 }
 0x166   :  { %v68_v17 = vsel %vm67_vm3, %v55_v16, %v1022_v13  ;;  %vm427_vm3 = vcmask 293888  }
 0x167   :  { %v70_v18 = vsel %vm69_vm4, %v68_v17, %v65_v15 }
 0x168   :  { %v72_v20 = vsel %vm71_vm5, %v70_v18, 1.0  ;;  %vm713_vm5 = vcmask 519170  }
 0x169   :  { %873 = vmatpush.msk.msra.mxu0 %vm82_vm6, %v72_v20 }
 0x16a   :  { %874 = vmatmul.msk.f32.vlgmr.msra.gmra.mxu0 %vm75_vm7, %v73_v19 }
 0x172   :  { %875 = vmatmul.msk.f32.gmra.mxu0 %vm75_vm7, %v74_v21  ;;  %vm835_vm7 = vcmask 9216  }
 0x1e7   :  { %v1168_v22 = vpop.f32.mrf.mxu0 }
 0x1e8   :  { %110 = vst.msk [vmem:[%s1528_s6] sm:$0xff] %vm109_vm8, %v1168_v22  ;;  %876 = vmatmul.msk.f32.vlgmr.msra.gmra.mxu1 %vm109_vm8, %v1168_v22  ;;  %v113_v23 = vmul.f32 %v1168_v22, %v1168_v22 }
 0x1ea   :  { %v117_v24 = vrot.slane %v113_v23, 4 }
 0x1ef   :  { %v1179_v25 = vpop.f32.mrf.mxu0 }
 0x1f0   :  { %112 = vst.msk [vmem:[%s1528_s6 + $0x8] sm:$0xf] %vm111_vm9, %v1179_v25  ;;  %v114_v26 = vmul.f32 %v1179_v25, %v1179_v25  ;;  %v121_v27 = vsel %vm82_vm6, %v1179_v25, %v117_v24 }
 0x1f1   :  { %877 = vmatmul.msk.f32.gmra.mxu1 %vm109_vm8, %v121_v27 }
 0x1f2   :  { %v118_v28 = vrot.slane %v114_v26, 4 }
 0x1f4   :  { %v119_v29 = vsel %vm82_vm6, %v117_v24, %v118_v28 }
 0x1f9   :  { %878 = vmatmul.msk.f32.gmra.mxu1 %vm109_vm8, %v119_v29 }
 0x265   :  { %v147_v30 = vpop.f32.mrf.mxu1 }
 0x266   :  { %v156_v31 = vmul.f32 0.03125, %v147_v30  ;;  %v1217_v30 = vld [vmem:[%s1525_s3 + $0x78] sm:$0xff] }
 0x268   :  { %v159_v32 = vmul.f32 %v156_v31, %v156_v31 }
 0x26a   :  { %v163_v35 = vrot.slane %v159_v32, 4  ;;  %v1223_v32 = vld [vmem:[%s1525_s3 + $0x60] sm:$0xff] }
 0x26e   :  { %v150_v34 = vpop.f32.mrf.mxu1 }
 0x26f   :  { %v157_v36 = vmul.f32 0.03125, %v150_v34  ;;  %v1235_v34 = vld [vmem:[%s1525_s3 + $0x68] sm:$0xff] }
 0x271   :  { %v160_v37 = vmul.f32 %v157_v36, %v157_v36  ;;  %v168_v38 = vsub.f32 %v157_v36, %v163_v35 }
 0x273   :  { %v170_v39 = vmax.f32 %v168_v38, 0.0  ;;  %v164_v40 = vrot.slane %v160_v37, 4  ;;  %v1252_v37 = vld [vmem:[%s1525_s3 + $0x40] sm:$0xff]  ;;  %v1257_v38 = vld [vmem:[%s1525_s3 + $0xb8] sm:$0xff] }
 0x275   :  { %v174_v41 = vadd.f32 1e-05, %v170_v39  ;;  %v165_v44 = vsel %vm82_vm6, %v163_v35, %v164_v40  ;;  %v1241_v35 = vld [vmem:[%s1525_s3 + $0x38] sm:$0xff] }
 0x276   :  { %v153_v42 = vpop.f32.mrf.mxu1 }
 0x277   :  { %1024 = vrsqrt.f32 %v174_v41  ;;  %v158_v43 = vmul.f32 0.03125, %v153_v42  ;;  %vm182_vm13 = vweird.f32 %v174_v41  ;;  %v1272_v42 = vld [vmem:[%s1525_s3 + $0x18] sm:$0xff] }
 0x279   :  { %v169_v45 = vsub.f32 %v158_v43, %v165_v44 }
 0x27b   :  { %v171_v46 = vmax.f32 %v169_v45, 0.0 }
 0x27d   :  { %v1025_v47 = vpop.eup %1024  ;;  %v175_v48 = vadd.f32 1e-05, %v171_v46 }
 0x27e   :  { %v177_v49 = vmul.f32 %v1025_v47, %v174_v41  ;;  %vm183_vm11 = vweird.f32 %v1025_v47  ;;  %v1267_v41 = vld [vmem:[%s1525_s3 + $0x28] sm:$0xff] }
 0x27f   :  { %1026 = vrsqrt.f32 %v175_v48  ;;  %vm192_vm12 = vweird.f32 %v175_v48  ;;  %vm184_vm15 = vmor %vm182_vm13, %vm183_vm11 }
 0x280   :  { %v178_v50 = vmul.f32 %v1025_v47, %v177_v49 }
 0x282   :  { %v179_v52 = vmul.f32 0.5, %v178_v50 }
 0x284   :  { %v180_v55 = vsub.f32 1.5, %v179_v52 }
 0x285   :  { %v1027_v51 = vpop.eup %1026 }
 0x286   :  { %v187_v53 = vmul.f32 %v1027_v51, %v175_v48  ;;  %vm193_vm10 = vweird.f32 %v1027_v51  ;;  %v181_v58 = vmul.f32 %v1025_v47, %v180_v55  ;;  %v1286_v48 = vld [vmem:[%s1525_s3 + $0xb0] sm:$0xff]  ;;  %v1331_v55 = vld [vmem:[%s1525_s3 + $0x8] sm:$0xff] }
 0x287   :  { %vm194_vm14 = vmor %vm192_vm12, %vm193_vm10 }
 0x288   :  { %v188_v54 = vmul.f32 %v1027_v51, %v187_v53  ;;  %v185_v63 = vsel %vm184_vm15, %v1025_v47, %v181_v58  ;;  %v1307_v53 = vld [vmem:[%s1525_s3] sm:$0xff] }
 0x289   :  { %v198_v1 = vrot.slane %v185_v63, 4  ;;  %v1354_v58 = vld [vmem:[%s1525_s3 + $0x80] sm:$0xff] }
 0x28a   :  { %v189_v56 = vmul.f32 0.5, %v188_v54  ;;  %v1324_v54 = vld [vmem:[%s1525_s3 + $0x10] sm:$0xff] }
 0x28c   :  { %v190_v57 = vsub.f32 1.5, %v189_v56  ;;  %v1340_v56 = vld [vmem:[%s1525_s3 + $0x48] sm:$0xff] }
 0x28e   :  { %v191_v59 = vmul.f32 %v1027_v51, %v190_v57  ;;  %v1347_v57 = vld [vmem:[%s1525_s3 + $0x98] sm:$0xff] }
 0x290   :  { %v195_v61 = vsel %vm194_vm14, %v1027_v51, %v191_v59  ;;  %v1301_v51 = vld [vmem:[%s1525_s3 + $0x30] sm:$0xff]  ;;  %v1367_v59 = vld [vmem:[%s1525_s3 + $0x88] sm:$0xff] }
 0x291   :  { %v199_v62 = vrot.slane %v195_v61, 4  ;;  %v1385_v61 = vld [vmem:[%s1525_s3 + $0xa8] sm:$0xff] }
 0x293   :  { %v204_v0 = vmul.f32 %v199_v62, %v173_v60  ;;  %v200_v4 = vsel %vm82_vm6, %v198_v1, %v199_v62  ;;  %v1397_v62 = vld [vmem:[%s1525_s3 + $0x90] sm:$0xff] }
 0x294   :  { %v203_v5 = vmul.f32 %v200_v4, %v172_v3 }
 0x295   :  { %224 = vperm.xlu0 %956, %v204_v0   ;;  %v206_v2 = vmul.f32 %v204_v0, %v157_v36  ;;  %v1247_v36 = vld [vmem:[%s1525_s3 + $0x70] sm:$0xff] }
 0x296   :  { %v205_v6 = vmul.f32 %v203_v5, %v156_v31  ;;  %v1087_v31 = vmov 36  }
 0x297   :  { %211 = vrot.lane.b32.xlu2 %v206_v2, %s1085_s21 }
 0x29d   :  { %961 = vset.pattern.permute.xlu0 %v1087_v31 }
 0x29f   :  { %209 = vrot.lane.b32.xlu2 %v205_v6, %s1085_s21 }
 0x2a7   :  { %219 = vperm.xlu2 %957, %v203_v5  }
 0x2af   :  { %960 = vset.pattern.permute.xlu2 %v1087_v31 }
 0x2f1   :  { %v212_v8 = vpop.permute.xlu2 %211 }
 0x2f2   :  { %v216_v9 = vsub.f32 %v173_v60, %v212_v8  ;;  %v1379_v60 = vld [vmem:[%s1525_s3 + $0x20] sm:$0xff]  ;;  %s1088_s3 = smov 91  }
 0x2f4   :  { %236 = vperm.xlu1 %958, %v216_v9  }
 0x2f9   :  { %v210_v11 = vpop.permute.xlu2 %209 }
 0x2fa   :  { %v215_v13 = vsub.f32 %v172_v3, %v210_v11 }
 0x2fc   :  { %231 = vperm.xlu1 %958, %v215_v13  }
 0x301   :  { %v220_v18 = vpop.permute.xlu2 %219 }
 0x302   :  { %v227_v19 = vmul.f32 %v220_v18, %v1168_v22 }
 0x304   :  { %959 = vset.pattern.permute.xlu1 %v1087_v31 }
 0x307   :  { %v225_v14 = vpop.permute.xlu0 %224 }
 0x308   :  { %v228_v15 = vmul.f32 %v225_v14, %v1179_v25 }
 0x366   :  { %v237_v16 = vpop.permute.xlu1 %236 }
 0x367   :  { %v240_v17 = vadd.f32 %v237_v16, %v228_v15 }
 0x369   :  { %244 = vrot.lane.b32.xlu2 %v240_v17, %s1080_s29  ;;  %v278_v46 = vrot.slane %v240_v17, 4 }
 0x36e   :  { %v232_v20 = vpop.permute.xlu1 %231 }
 0x36f   :  { %v239_v21 = vadd.f32 %v232_v20, %v227_v19 }
 0x371   :  { %241 = vrot.lane.b32.xlu0 %v239_v21, %s1080_s29  ;;  %v277_v44 = vrot.slane %v239_v21, 4 }
 0x373   :  { %v279_v49 = vsel %vm82_vm6, %v277_v44, %v278_v46 }
 0x3c3   :  { %v245_v23 = vpop.permute.xlu2 %244 }
 0x3c4   :  { %v246_v24 = vsel %vm44_vm0, %v245_v23, %v240_v17 }
 0x3c5   :  { %249 = vrot.lane.b32.xlu1 %v246_v24, %s1080_s29 }
 0x3e3   :  { %v242_v26 = vpop.permute.xlu0 %241 }
 0x3e4   :  { %v243_v27 = vsel %vm44_vm0, %v242_v26, %v239_v21 }
 0x3e5   :  { %247 = vrot.lane.b32.xlu2 %v243_v27, %s1080_s29 }
 0x437   :  { %v250_v25 = vpop.permute.xlu1 %249 }
 0x438   :  { %v252_v28 = vsel %vm44_vm0, %v250_v25, %v240_v17 }
 0x439   :  { %259 = vrot.lane.b32.xlu2 %v252_v28, %s1082_s9  ;;  %269 = vrot.lane.b32.xlu0 %v252_v28, %s1081_s30 }
 0x43f   :  { %v248_v22 = vpop.permute.xlu2 %247 }
 0x440   :  { %v251_v29 = vsel %vm44_vm0, %v248_v22, %v239_v21  ;;  %vm880_vm0 = vmneg %vm1145_vm1 }
 0x441   :  { %257 = vrot.lane.b32.xlu0 %v251_v29, %s1082_s9  ;;  %267 = vrot.lane.b32.xlu1 %v251_v29, %s1081_s30 }
 0x442   :  { %379 = vperm.xlu2 %960, %v1247_v36  }
 0x449   :  { %384 = vperm.xlu1 %959, %v1217_v30   ;;  %374 = vperm.xlu0 %961, %v1235_v34  }
 0x44a   :  { %364 = vperm.xlu2 %960, %v1312_v12  }
 0x451   :  { %369 = vperm.xlu1 %959, %v1223_v32   ;;  %349 = vperm.xlu0 %961, %v1252_v37  }
 0x452   :  { %354 = vperm.xlu2 %960, %v1340_v56  }
 0x459   :  { %359 = vperm.xlu1 %959, %v1229_v33   ;;  %334 = vperm.xlu0 %961, %v1267_v41  }
 0x45a   :  { %339 = vperm.xlu2 %960, %v1301_v51  }
 0x461   :  { %344 = vperm.xlu1 %959, %v1241_v35   ;;  %419 = vperm.xlu0 %961, %v1286_v48  }
 0x462   :  { %329 = vperm.xlu2 %960, %v1379_v60  }
 0x469   :  { %424 = vperm.xlu1 %959, %v1257_v38   ;;  %319 = vperm.xlu0 %961, %v1324_v54  }
 0x46a   :  { %414 = vperm.xlu2 %960, %v1385_v61  }
 0x471   :  { %324 = vperm.xlu1 %959, %v1272_v42   ;;  %404 = vperm.xlu0 %961, %v1347_v57  }
 0x472   :  { %314 = vperm.xlu2 %960, %v1331_v55  }
 0x479   :  { %409 = vperm.xlu1 %959, %v1292_v10   ;;  %394 = vperm.xlu0 %961, %v1367_v59  }
 0x47a   :  { %399 = vperm.xlu2 %960, %v1397_v62  }
 0x481   :  { %309 = vperm.xlu1 %959, %v1307_v53  }
 0x489   :  { %389 = vperm.xlu1 %959, %v1354_v58  }
 0x493   :  { %v260_v43 = vpop.permute.xlu2 %259 }
 0x494   :  { %v264_v47 = vsel %vm1151_vm2, 0.0, %v260_v43 }
 0x495   :  { %v282_v50 = vsel %vm82_vm6, %v264_v47, %v277_v44 }
 0x49c   :  { %v380_v9 = vpop.permute.xlu2 %379 }
 0x4a4   :  { %v365_v26 = vpop.permute.xlu2 %364 }
 0x4ab   :  { %v270_v39 = vpop.permute.xlu0 %269 }
 0x4ac   :  { %v274_v40 = vsel %vm1145_vm1, 0.0, %v270_v39  ;;  %vm882_vm1 = vmneg %vm1151_vm2  ;;  %vm792_vm2 = vcmask 523264  }
 0x4ad   :  { %879 = vmatpush.msk.msrb.mxu0 %vm82_vm6, %v274_v40  ;;  %935 = vmatpush.msk.msrb.mxu1 %vm82_vm6, %v274_v40 }
 0x4ae   :  { %936 = vmatpush.msk.msra.mxu2 %vm82_vm6, %v274_v40  ;;  %v355_v40 = vpop.permute.xlu2 %354  ;;  %vm714_vm6 = vmor %vm713_vm5, %vm69_vm4 }
 0x4b3   :  { %v268_v45 = vpop.permute.xlu1 %267  ;;  %v258_v52 = vpop.permute.xlu0 %257 }
 0x4b4   :  { %881 = vmatpush.msk.msrb.mxu0 %vm880_vm0, %v268_v45  ;;  %937 = vmatpush.msk.msrb.mxu1 %vm880_vm0, %v268_v45 }
 0x4b5   :  { %938 = vmatpush.msk.msra.mxu2 %vm880_vm0, %v268_v45 }
 0x4b6   :  { %492 = vmatpush.msrb.mxu0 %v279_v49  ;;  %939 = vmatpush.msrb.mxu1 %v279_v49 }
 0x4b7   :  { %940 = vmatpush.msra.mxu2 %v279_v49 }
 0x4b8   :  { %493 = vmatpush.msrb.mxu0 %v282_v50  ;;  %941 = vmatpush.msrb.mxu1 %v282_v50 }
 0x4b9   :  { %942 = vmatpush.msra.mxu2 %v282_v50 }
 0x4ba   :  { %883 = vmatpush.msk.msrb.mxu0 %vm882_vm1, %v258_v52  ;;  %943 = vmatpush.msk.msrb.mxu1 %vm882_vm1, %v258_v52 }
 0x4bb   :  { %944 = vmatpush.msk.msra.mxu2 %vm882_vm1, %v258_v52  ;;  %890 = vmatmul.msk.f32.vlgmr.msrb.gmra.mxu1 %vm427_vm3, %v1301_v51  ;;  %v385_v5 = vpop.permute.xlu1 %384  ;;  %v375_v14 = vpop.permute.xlu0 %374 }
 0x4bc   :  { %897 = vmatmul.msk.f32.vlgmr.msra.gmra.mxu2 %vm427_vm3, %v1235_v34  ;;  %884 = vmatmul.msk.f32.vlgmr.msrb.gmra.mxu0 %vm427_vm3, %v1307_v53 }
 0x4c3   :  { %891 = vmatmul.msk.f32.gmra.mxu1 %vm427_vm3, %v1241_v35  ;;  %v370_v20 = vpop.permute.xlu1 %369  ;;  %v350_v49 = vpop.permute.xlu0 %349 }
 0x4c4   :  { %898 = vmatmul.msk.f32.gmra.mxu2 %vm427_vm3, %v1247_v36  ;;  %885 = vmatmul.msk.f32.gmra.mxu0 %vm427_vm3, %v1331_v55 }
 0x4cb   :  { %892 = vmatmul.msk.f32.gmra.mxu1 %vm427_vm3, %v1252_v37  ;;  %v360_v25 = vpop.permute.xlu1 %359 }
 0x4cc   :  { %899 = vmatmul.msk.f32.gmra.mxu2 %vm427_vm3, %v1217_v30  ;;  %886 = vmatmul.msk.f32.gmra.mxu0 %vm427_vm3, %v1324_v54 }
 0x4d3   :  { %893 = vmatmul.msk.f32.gmra.mxu1 %vm427_vm3, %v1340_v56  ;;  %v345_v44 = vpop.permute.xlu1 %344 }
 0x4d4   :  { %900 = vmatmul.msk.f32.gmra.mxu2 %vm427_vm3, %v1354_v58  ;;  %887 = vmatmul.msk.f32.gmra.mxu0 %vm427_vm3, %v1272_v42 }
 0x4db   :  { %894 = vmatmul.msk.f32.gmra.mxu1 %vm427_vm3, %v1229_v33 }
 0x4dc   :  { %901 = vmatmul.msk.f32.gmra.mxu2 %vm427_vm3, %v1367_v59  ;;  %888 = vmatmul.msk.f32.gmra.mxu0 %vm427_vm3, %v1379_v60 }
 0x4e3   :  { %895 = vmatmul.msk.f32.gmra.mxu1 %vm427_vm3, %v1312_v12 }
 0x4e4   :  { %902 = vmatmul.msk.f32.gmra.mxu2 %vm427_vm3, %v1397_v62  ;;  %889 = vmatmul.msk.f32.gmra.mxu0 %vm427_vm3, %v1267_v41 }
 0x4eb   :  { %896 = vmatmul.msk.f32.gmra.mxu1 %vm427_vm3, %v1223_v32 }
 0x4ec   :  { %903 = vmatmul.msk.f32.gmra.mxu2 %vm427_vm3, %v1347_v57 }
 0x4f4   :  { %904 = vmatmul.msk.f32.gmra.mxu2 %vm427_vm3, %v1292_v10 }
 0x4fc   :  { %905 = vmatmul.msk.f32.gmra.mxu2 %vm427_vm3, %v1385_v61 }
 0x504   :  { %906 = vmatmul.msk.f32.gmra.mxu2 %vm427_vm3, %v1286_v48 }
 0x50c   :  { %907 = vmatmul.msk.f32.gmra.mxu2 %vm427_vm3, %v1257_v38 }
 0x538   :  { %v1419_v63 = vpop.f32.mrf.mxu1 }
 0x539   :  { %v1421_v4 = vpop.f32.mrf.mxu0 }
 0x53f   :  { %v535_v0 = vpop.f32.mrf.mxu2 }
 0x540   :  { %v517_v1 = vpop.f32.mrf.mxu1  ;;  %v536_v15 = vadd.f32 %v535_v0, %v375_v14  ;;  %v967_v0 = vpack.i.bf16 %v1223_v32, %v1235_v34 }
 0x541   :  { %v1427_v19 = vpop.f32.mrf.mxu0 }
 0x542   :  { %v581_v21 = vmax.f32 %v536_v15, 0.0  ;;  %968 = vrot.lane.b32.xlu0 %v967_v0, %s1088_s3  ;;  %v972_v15 = vpack.i.bf16 %v1229_v33, %v1312_v12  ;;  %v987_v33 = vpack.i.bf16 %v1267_v41, %v1257_v38  ;;  %v1002_v38 = vpack.i.bf16 %v1324_v54, %v1292_v10 }
 0x543   :  { %v1007_v0 = vpack.i.bf16 %v1331_v55, %v1347_v57 }
 0x544   :  { %973 = vrot.lane.b32.xlu1 %v972_v15, %s1088_s3 }
 0x547   :  { %v538_v2 = vpop.f32.mrf.mxu2 }
 0x548   :  { %v520_v3 = vpop.f32.mrf.mxu1  ;;  %v539_v11 = vadd.f32 %v538_v2, %v380_v9  ;;  %v340_v2 = vpop.permute.xlu2 %339 }
 0x549   :  { %v1432_v27 = vpop.f32.mrf.mxu0 }
 0x54a   :  { %v582_v16 = vmax.f32 %v539_v11, 0.0  ;;  %v425_v11 = vpop.permute.xlu1 %424 }
 0x54c   :  { %988 = vrot.lane.b32.xlu1 %v987_v33, %s1088_s3 }
 0x54f   :  { %v541_v6 = vpop.f32.mrf.mxu2 }
 0x550   :  { %v542_v7 = vadd.f32 %v541_v6, %v385_v5  ;;  %v523_v8 = vpop.f32.mrf.mxu1  ;;  %v521_v6 = vadd.f32 %v520_v3, %v350_v49  ;;  %v330_v32 = vpop.permute.xlu2 %329  ;;  %v515_v3 = vadd.f32 %v1419_v63, %v340_v2 }
 0x551   :  { %v505_v43 = vpop.f32.mrf.mxu0  ;;  %v524_v50 = vadd.f32 %v523_v8, %v355_v40  ;;  %v518_v8 = vadd.f32 %v517_v1, %v345_v44  ;;  %v982_v1 = vpack.i.bf16 %v1301_v51, %v1241_v35  ;;  %v977_v44 = vpack.i.bf16 %v1252_v37, %v1340_v56 }
 0x552   :  { %v583_v13 = vmax.f32 %v542_v7, 0.0  ;;  %v576_v14 = vmax.f32 %v521_v6, 0.0 }
 0x553   :  { %v577_v7 = vmax.f32 %v524_v50, 0.0  ;;  %v575_v34 = vmax.f32 %v518_v8, 0.0  ;;  %983 = vrot.lane.b32.xlu0 %v982_v1, %s1088_s3  ;;  %v992_v50 = vpack.i.bf16 %v1379_v60, %v1286_v48  ;;  %v592_v48 = vld [vmem:[%s1527_s5] sm:$0x3]  ;;  %s1089_s5 = smov [#allocation2]  }
 0x554   :  { %908 = vmatpush.xpose.msk.msra.mxu3 %vm109_vm8, %v583_v13  ;;  %v335_v13 = vpop.permute.xlu0 %334  ;;  %1003 = vrot.lane.b32.xlu1 %v1002_v38, %s1088_s3  ;;  %s844_s20 = sshll.u32 %s1089_s5, 4  ;;  %s845_s20 = int_to_ptr.vmem [resolvable:$true] %s844_s20 }
 0x557   :  { %v1424_v17 = vpop.f32.mrf.mxu2 }
 0x558   :  { %909 = vmatpush.xpose.msk.msra.mxu3 %vm109_vm8, %v582_v16  ;;  %v526_v18 = vpop.f32.mrf.mxu1 }
 0x559   :  { %v527_v45 = vadd.f32 %v526_v18, %v360_v25  ;;  %v508_v5 = vpop.f32.mrf.mxu0 }
 0x55a   :  { %v509_v12 = vadd.f32 %v508_v5, %v330_v32 }
 0x55b   :  { %v578_v52 = vmax.f32 %v527_v45, 0.0 }
 0x55c   :  { %910 = vmatpush.xpose.msk.msra.mxu3 %vm109_vm8, %v581_v21  ;;  %v574_v21 = vmax.f32 %v515_v3, 0.0  ;;  %v572_v51 = vmax.f32 %v509_v12, 0.0 }
 0x55f   :  { %v1430_v23 = vpop.f32.mrf.mxu2 }
 0x560   :  { %v529_v24 = vpop.f32.mrf.mxu1 }
 0x561   :  { %v530_v31 = vadd.f32 %v529_v24, %v365_v26  ;;  %v511_v18 = vpop.f32.mrf.mxu0  ;;  %v420_v26 = vpop.permute.xlu0 %419 }
 0x562   :  { %v512_v24 = vadd.f32 %v511_v18, %v335_v13 }
 0x563   :  { %v579_v46 = vmax.f32 %v530_v31, 0.0  ;;  %v997_v31 = vpack.i.bf16 %v1272_v42, %v1385_v61 }
 0x564   :  { %v573_v63 = vmax.f32 %v512_v24, 0.0 }
 0x565   :  { %998 = vrot.lane.b32.xlu0 %v997_v31, %s1088_s3 }
 0x567   :  { %v1434_v28 = vpop.f32.mrf.mxu2 }
 0x568   :  { %v532_v22 = vpop.f32.mrf.mxu1 }
 0x569   :  { %v533_v29 = vadd.f32 %v532_v22, %v370_v20  ;;  %v325_v20 = vpop.permute.xlu1 %324  ;;  %v415_v22 = vpop.permute.xlu2 %414 }
 0x56a   :  { %v506_v35 = vadd.f32 %v505_v43, %v325_v20  ;;  %v320_v41 = vpop.permute.xlu0 %319 }
 0x56b   :  { %v580_v39 = vmax.f32 %v533_v29, 0.0  ;;  %v962_v29 = vpack.i.bf16 %v1247_v36, %v1217_v30  ;;  %v503_v30 = vadd.f32 %v1432_v27, %v320_v41  ;;  %v1012_v27 = vpack.i.bf16 %v1307_v53, %v1397_v62 }
 0x56c   :  { %v571_v36 = vmax.f32 %v506_v35, 0.0 }
 0x56d   :  { %911 = vmatpush.xpose.msk.msra.mxu3 %vm109_vm8, %v580_v39  ;;  %963 = vrot.lane.b32.xlu2 %v962_v29, %s1088_s3  ;;  %v570_v54 = vmax.f32 %v503_v30, 0.0 }
 0x56e   :  { %1013 = vrot.lane.b32.xlu0 %v1012_v27, %s1088_s3 }
 0x56f   :  { %v1437_v47 = vpop.f32.mrf.mxu2 }
 0x571   :  { %912 = vmatpush.xpose.msk.msra.mxu3 %vm109_vm8, %v579_v46  ;;  %v410_v39 = vpop.permute.xlu1 %409  ;;  %v315_v42 = vpop.permute.xlu2 %314  ;;  %v1017_v46 = vpack.i.bf16 %v1354_v58, %v1367_v59 }
 0x572   :  { %v500_v10 = vadd.f32 %v1427_v19, %v315_v42  ;;  %v405_v53 = vpop.permute.xlu0 %404 }
 0x573   :  { %1018 = vrot.lane.b32.xlu1 %v1017_v46, %s1088_s3  ;;  %v554_v60 = vadd.f32 %v1437_v47, %v405_v53 }
 0x575   :  { %913 = vmatpush.xpose.msk.msra.mxu3 %vm109_vm8, %v578_v52  ;;  %978 = vrot.lane.b32.xlu2 %v977_v44, %s1088_s3  ;;  %v569_v52 = vmax.f32 %v500_v10, 0.0  ;;  %v587_v6 = vmax.f32 %v554_v60, 0.0 }
 0x577   :  { %v1443_v9 = vpop.f32.mrf.mxu2 }
 0x578   :  { %v557_v58 = vadd.f32 %v1443_v9, %v410_v39 }
 0x579   :  { %914 = vmatpush.xpose.msk.msra.mxu3 %vm109_vm8, %v577_v7  ;;  %v310_v37 = vpop.permute.xlu1 %309  ;;  %v400_v2 = vpop.permute.xlu2 %399 }
 0x57a   :  { %v497_v19 = vadd.f32 %v1421_v4, %v310_v37  ;;  %v588_v4 = vmax.f32 %v557_v58, 0.0  ;;  %v551_v5 = vadd.f32 %v1434_v28, %v400_v2  ;;  %v395_v7 = vpop.permute.xlu0 %394  ;;  %v1023_v37 = vld [vmem:[%s1526_s4] ss:$0 sm:$0xff] }
 0x57b   :  { %v548_v9 = vadd.f32 %v1430_v23, %v395_v7 }
 0x57c   :  { %v568_v62 = vmax.f32 %v497_v19, 0.0  ;;  %v586_v47 = vmax.f32 %v551_v5, 0.0 }
 0x57d   :  { %915 = vmatpush.xpose.msk.msra.mxu3 %vm109_vm8, %v576_v14  ;;  %993 = vrot.lane.b32.xlu2 %v992_v50, %s1088_s3  ;;  %v585_v57 = vmax.f32 %v548_v9, 0.0 }
 0x57f   :  { %v559_v16 = vpop.f32.mrf.mxu2 }
 0x580   :  { %v560_v56 = vadd.f32 %v559_v16, %v415_v22 }
 0x581   :  { %916 = vmatpush.xpose.msk.msra.mxu3 %vm109_vm8, %v575_v34 }
 0x582   :  { %v589_v59 = vmax.f32 %v560_v56, 0.0 }
 0x585   :  { %917 = vmatpush.xpose.msk.msra.mxu3 %vm109_vm8, %v574_v21  ;;  %1008 = vrot.lane.b32.xlu2 %v1007_v0, %s1088_s3 }
 0x587   :  { %v562_v25 = vpop.f32.mrf.mxu2 }
 0x588   :  { %v563_v61 = vadd.f32 %v562_v25, %v420_v26 }
 0x589   :  { %918 = vmatpush.xpose.msk.msra.mxu3 %vm109_vm8, %v573_v63 }
 0x58a   :  { %v590_v49 = vmax.f32 %v563_v61, 0.0 }
 0x58d   :  { %919 = vmatpush.xpose.msk.msra.mxu3 %vm109_vm8, %v572_v51 }
 0x58f   :  { %v565_v40 = vpop.f32.mrf.mxu2 }
 0x590   :  { %v566_v43 = vadd.f32 %v565_v40, %v425_v11  ;;  %v390_v11 = vpop.permute.xlu1 %389 }
 0x591   :  { %920 = vmatpush.xpose.msk.msra.mxu3 %vm109_vm8, %v571_v36  ;;  %v545_v55 = vadd.f32 %v1424_v17, %v390_v11 }
 0x592   :  { %v591_v45 = vmax.f32 %v566_v43, 0.0 }
 0x593   :  { %v584_v13 = vmax.f32 %v545_v55, 0.0 }
 0x594   :  { %925 = vmatpush.xpose.msk.msra.mxu0 %vm109_vm8, %v591_v45 }
 0x595   :  { %921 = vmatpush.xpose.msk.msra.mxu3 %vm109_vm8, %v570_v54 }
 0x598   :  { %926 = vmatpush.xpose.msk.msra.mxu0 %vm109_vm8, %v590_v49 }
 0x599   :  { %922 = vmatpush.xpose.msk.msra.mxu3 %vm109_vm8, %v569_v52 }
 0x59c   :  { %927 = vmatpush.xpose.msk.msra.mxu0 %vm109_vm8, %v589_v59 }
 0x59d   :  { %923 = vmatpush.xpose.msk.msra.mxu3 %vm109_vm8, %v568_v62 }
 0x5a0   :  { %928 = vmatpush.xpose.msk.msra.mxu0 %vm109_vm8, %v588_v4  ;;  %924 = vmatmul.msk.f32.vlgmr.msra.gmra.mxu3 %vm109_vm8, %v592_v48 }
 0x5a4   :  { %929 = vmatpush.xpose.msk.msra.mxu0 %vm109_vm8, %v587_v6 }
 0x5a8   :  { %930 = vmatpush.xpose.msk.msra.mxu0 %vm109_vm8, %v586_v47 }
 0x5ac   :  { %931 = vmatpush.xpose.msk.msra.mxu0 %vm109_vm8, %v585_v57 }
 0x5b0   :  { %932 = vmatpush.xpose.msk.msra.mxu0 %vm109_vm8, %v584_v13 }
 0x5b3   :  { %933 = vmatmul.msk.f32.vlgmr.msra.gmra.mxu0 %vm109_vm8, %v592_v48 }
 0x5b4   :  { %v969_v23 = vpop.permute.xlu0 %968 }
 0x5b5   :  { %v971_v15 = vunpack.i.h.bf16 %v969_v23  ;;  %v970_v32 = vunpack.i.l.bf16 %v969_v23 }
 0x5b6   :  { %v974_v17 = vpop.permute.xlu1 %973 }
 0x5b7   :  { %v976_v3 = vunpack.i.h.bf16 %v974_v17  ;;  %v975_v16 = vunpack.i.l.bf16 %v974_v17 }
 0x5be   :  { %v989_v33 = vpop.permute.xlu1 %988 }
 0x5bf   :  { %v991_v12 = vunpack.i.h.bf16 %v989_v33  ;;  %v990_v63 = vunpack.i.l.bf16 %v989_v33 }
 0x5c1   :  { %823 = vmatpush.msrb.mxu0 %v990_v63 }
 0x5c5   :  { %v984_v24 = vpop.permute.xlu0 %983 }
 0x5c6   :  { %v986_v1 = vunpack.i.h.bf16 %v984_v24  ;;  %v985_v26 = vunpack.i.l.bf16 %v984_v24  ;;  %v1004_v39 = vpop.permute.xlu1 %1003 }
 0x5c7   :  { %v964_v28 = vpop.permute.xlu2 %963  ;;  %v1006_v38 = vunpack.i.h.bf16 %v1004_v39  ;;  %v1005_v41 = vunpack.i.l.bf16 %v1004_v39 }
 0x5c8   :  { %v966_v8 = vunpack.i.h.bf16 %v964_v28  ;;  %v965_v14 = vunpack.i.l.bf16 %v964_v28 }
 0x5ca   :  { %795 = vmatpush.msra.mxu1 %v965_v14 }
 0x5cc   :  { %796 = vmatpush.msra.mxu1 %v966_v8 }
 0x5ce   :  { %797 = vmatpush.msra.mxu1 %v970_v32 }
 0x5cf   :  { %v979_v34 = vpop.permute.xlu2 %978 }
 0x5d0   :  { %798 = vmatpush.msra.mxu1 %v971_v15  ;;  %v980_v18 = vunpack.i.l.bf16 %v979_v34  ;;  %v981_v20 = vunpack.i.h.bf16 %v979_v34 }
 0x5d2   :  { %799 = vmatpush.msra.mxu1 %v975_v16 }
 0x5d4   :  { %800 = vmatpush.msra.mxu1 %v976_v3 }
 0x5d6   :  { %801 = vmatpush.msra.mxu1 %v980_v18 }
 0x5d7   :  { %v994_v21 = vpop.permute.xlu2 %993  ;;  %v999_v29 = vpop.permute.xlu0 %998 }
 0x5d8   :  { %802 = vmatpush.msra.mxu1 %v981_v20  ;;  %v995_v25 = vunpack.i.l.bf16 %v994_v21  ;;  %v996_v22 = vunpack.i.h.bf16 %v994_v21  ;;  %v1001_v51 = vunpack.i.h.bf16 %v999_v29  ;;  %v1000_v31 = vunpack.i.l.bf16 %v999_v29 }
 0x5da   :  { %803 = vmatpush.msra.mxu1 %v985_v26  ;;  %824 = vmatpush.msrb.mxu0 %v995_v25 }
 0x5dc   :  { %804 = vmatpush.msra.mxu1 %v986_v1  ;;  %825 = vmatpush.msrb.mxu0 %v1000_v31 }
 0x5de   :  { %805 = vmatpush.msra.mxu1 %v991_v12  ;;  %826 = vmatpush.msrb.mxu0 %v1005_v41 }
 0x5df   :  { %v1009_v35 = vpop.permute.xlu2 %1008 }
 0x5e0   :  { %806 = vmatpush.msra.mxu1 %v996_v22  ;;  %v1011_v30 = vunpack.i.h.bf16 %v1009_v35  ;;  %v1010_v36 = vunpack.i.l.bf16 %v1009_v35  ;;  %v1014_v40 = vpop.permute.xlu0 %1013 }
 0x5e1   :  { %v1016_v43 = vunpack.i.h.bf16 %v1014_v40  ;;  %v1015_v44 = vunpack.i.l.bf16 %v1014_v40 }
 0x5e2   :  { %807 = vmatpush.msra.mxu1 %v1001_v51  ;;  %827 = vmatpush.msrb.mxu0 %v1010_v36 }
 0x5e4   :  { %808 = vmatpush.msra.mxu1 %v1006_v38  ;;  %828 = vmatpush.msrb.mxu0 %v1015_v44 }
 0x5e5   :  { %v1019_v42 = vpop.permute.xlu1 %1018 }
 0x5e6   :  { %809 = vmatpush.msra.mxu1 %v1011_v30  ;;  %v1021_v61 = vunpack.i.h.bf16 %v1019_v42  ;;  %v1020_v45 = vunpack.i.l.bf16 %v1019_v42 }
 0x5e8   :  { %810 = vmatpush.msra.mxu1 %v1016_v43  ;;  %829 = vmatpush.msrb.mxu0 %v1020_v45 }
 0x5ea   :  { %830 = vmatpush.msrb.mxu0 %v1021_v61 }
 0x623   :  { %v685_v10 = vpop.f32.mrf.mxu3 }
 0x624   :  { %811 = vmatmul.f32.vlgmr.msra.gmra.mxu1 %v685_v10 }
 0x630   :  { %v705_v54 = vpop.f32.mrf.mxu0 }
 0x631   :  { %v710_v27 = vrot.slane %v705_v54, 6  ;;  %934 = vmatmul.msk.f32.vlgmr.msrb.gmra.mxu0 %vm792_vm2, %v705_v54 }
 0x633   :  { %v711_v46 = vsel %vm69_vm4, %v685_v10, %v710_v27 }
 0x634   :  { %715 = vst.msk [vmem:[#allocation2] sm:$0xf] %vm714_vm6, %v711_v46 }
 0x635   :  { %849 = dma.vmem_to_hbm [thread:$0]  %s845_s20, 64, %s847_s22, [#allocation3]  }
 0x6a1   :  { %v812_v56 = vpop.f32.mrf.mxu1 }
 0x6a2   :  { %v813_v49 = vadd.f32 %v1023_v37, %v812_v56 }
 0x6ae   :  { %v832_v50 = vpop.f32.mrf.mxu0 }
 0x6af   :  { %v833_v19 = vadd.f32 %v832_v50, %v813_v49 }
 0x6b1   :  { %836 = vst.msk [vmem:[#allocation4] sm:$0x3] %vm835_vm7, %v833_v19 }
 0x6b2   :  { %860 = dma.vmem_to_hbm [thread:$0]  %s856_s26, 32, %s858_s28, [#allocation5]  }
 0x6b3   :  { %1076 = dma.done.wait [#allocation3], 64  }
 0x6b4   :  { %1077 = vsyncadd [#allocation3], 4294967232 }
 0x6b5   :  { %1078 = dma.done.wait [#allocation5], 32  }
 0x6b6   :  { %1079 = vsyncadd [#allocation5], 4294967264 }
 0x6b7   :  { %871 = vsyncpa [#allocation3], 1 }
 0x6b8   :  { %872 = vsyncpa [#allocation5], 1 }

</bundles_post_ra>
